<compile_context>
chip_gen: v7x
topology: tpu7x:2x2x1
jax: 0.10.0
libtpu: 0.0.40
codegen_flags: <defaults>
</compile_context>

<pallas_src>
import jax
import jax.numpy as jnp
from jax.experimental import pallas as pl
from jax.experimental.pallas import tpu as pltpu

OUT_PAD = 128  # lane-dense width of the (padded) scalar head


def critic_kernel(x_ref, w1_ref, w2_ref, w3_ref, b_ref, out_ref):
    """out = relu(relu(x @ w1 + b1) @ w2 + b2) @ w3_pad + b3_pad."""
    x = x_ref[...]                                                    # (B, obs_dim)

    # fc1 + ReLU
    h1 = jnp.dot(x, w1_ref[...], preferred_element_type=jnp.float32)
    h1 = jnp.maximum(h1 + b_ref[0:1, :], 0.0)                         # (B, H)

    # fc2 + ReLU
    h2 = jnp.dot(h1, w2_ref[...], preferred_element_type=jnp.float32)
    h2 = jnp.maximum(h2 + b_ref[1:2, :], 0.0)                         # (B, H)

    # fc3 head, padded to OUT_PAD lanes (column 0 is the real Q-value)
    q = jnp.dot(h2, w3_ref[...], preferred_element_type=jnp.float32)
    q = q + b_ref[2:3, :OUT_PAD]                                      # (B, OUT_PAD)

    out_ref[...] = q.astype(out_ref.dtype)


def init_critic_params(key, obs_dim, hidden=256):
    """Mirrors nn.Linear's U(-1/sqrt(fan_in), 1/sqrt(fan_in)) init.
    Weights stored as (in, out) for the x @ W convention."""
    def linear(k, fan_in, fan_out):
        kw, kb = jax.random.split(k)
        bound = 1.0 / jnp.sqrt(jnp.float32(fan_in))
        w = jax.random.uniform(kw, (fan_in, fan_out), jnp.float32, -bound, bound)
        b = jax.random.uniform(kb, (fan_out,), jnp.float32, -bound, bound)
        return w, b

    k1, k2, k3 = jax.random.split(key, 3)
    w1, b1 = linear(k1, obs_dim, hidden)
    w2, b2 = linear(k2, hidden, hidden)
    w3, b3 = linear(k3, hidden, 1)
    return (w1, b1, w2, b2, w3, b3)


def pack_critic_params(params, out_pad=OUT_PAD):
    """One-time packing: pad the scalar head to `out_pad` lanes and pack all
    biases into a single (3, H) array to minimize kernel operand / DMA count."""
    w1, b1, w2, b2, w3, b3 = params
    H = w1.shape[1]
    assert H >= out_pad, "bias pack assumes hidden >= OUT_PAD"

    w3_pad = jnp.zeros((H, out_pad), jnp.float32).at[:, :1].set(w3)
    biases = jnp.zeros((3, H), jnp.float32)
    biases = biases.at[0, :].set(b1)
    biases = biases.at[1, :].set(b2)
    biases = biases.at[2, 0].set(b3[0])
    return (w1, w2, w3_pad, biases)


def critic_forward(x, packed_params):
    """x: (B, obs_dim) float32.  Returns q: (B, 1) float32."""
    w1, w2, w3_pad, biases = packed_params
    B = x.shape[0]

    vmem = pl.BlockSpec(memory_space=pltpu.MemorySpace.VMEM)
    q_pad = pl.pallas_call(
        critic_kernel,
        out_shape=jax.ShapeDtypeStruct((B, OUT_PAD), jnp.float32),
        in_specs=[vmem, vmem, vmem, vmem, vmem],
        out_specs=vmem,
    )(x, w1, w2, w3_pad, biases)
    # TODO(synk): if B ever grows large (>=1024), add a batch grid axis with
    # weight BlockSpecs using constant index_maps and mark it "parallel".
    return q_pad[:, :1]


def critic_forward_ref(x, params):
    """Plain-JAX reference for correctness checking."""
    w1, b1, w2, b2, w3, b3 = params
    h1 = jnp.maximum(x @ w1 + b1, 0.0)
    h2 = jnp.maximum(h1 @ w2 + b2, 0.0)
    return h2 @ w3 + b3


if __name__ == "__main__":
    key = jax.random.PRNGKey(0)
    k_params, k_x = jax.random.split(key)

    obs_dim = 3      # e.g. Pendulum-v1 observation dim (SAC example)
    batch = 8

    params = init_critic_params(k_params, obs_dim)
    packed = pack_critic_params(params)
    x = jax.random.normal(k_x, (batch, obs_dim), dtype=jnp.float32)

    q = critic_forward(x, packed)
    q = jax.block_until_ready(q)

    q_ref = critic_forward_ref(x, params)
    assert q.shape == (batch, 1), q.shape
    assert jnp.allclose(q, q_ref, atol=1e-5, rtol=1e-5), float(jnp.max(jnp.abs(q - q_ref)))

    print("KERNEL_OK")
</pallas_src>

<mosaic_0001>
module attributes {stable_mosaic.version = 11 : i64} {
  func.func @critic_kernel(%arg0: memref<8x3xf32, #tpu.memory_space<vmem>>, %arg1: memref<3x256xf32, #tpu.memory_space<vmem>>, %arg2: memref<256x256xf32, #tpu.memory_space<vmem>>, %arg3: memref<256x128xf32, #tpu.memory_space<vmem>>, %arg4: memref<3x256xf32, #tpu.memory_space<vmem>>, %arg5: memref<8x128xf32, #tpu.memory_space<vmem>>) attributes {dimension_semantics = [], scalar_prefetch = 0 : i64, scratch_operands = 0 : i64, tpu.core_type = #tpu.core_type<tc>} {
    %c0 = arith.constant 0 : index
    %c0_0 = arith.constant 0 : index
    %0 = vector.load %arg0[%c0, %c0_0] : memref<8x3xf32, #tpu.memory_space<vmem>>, vector<8x3xf32>
    %c0_1 = arith.constant 0 : index
    %c0_2 = arith.constant 0 : index
    %1 = vector.load %arg1[%c0_1, %c0_2] : memref<3x256xf32, #tpu.memory_space<vmem>>, vector<3x256xf32>
    %cst = arith.constant dense<0.000000e+00> : vector<8x256xf32>
    %2 = tpu.matmul %0, %1, %cst {dimension_numbers = #tpu.dot_dimension_numbers<[1], [0], [0], [1], [0, 0, 1, 1], [], []>} : vector<8x3xf32>, vector<3x256xf32>, vector<8x256xf32> -> vector<8x256xf32>
    %c0_3 = arith.constant 0 : index
    %c0_4 = arith.constant 0 : index
    %3 = vector.load %arg4[%c0_3, %c0_4] : memref<3x256xf32, #tpu.memory_space<vmem>>, vector<1x256xf32>
    %4 = vector.broadcast %3 : vector<1x256xf32> to vector<8x256xf32>
    %5 = arith.addf %2, %4 : vector<8x256xf32>
    %cst_5 = arith.constant 0.000000e+00 : f32
    %6 = vector.broadcast %cst_5 : f32 to vector<8x256xf32>
    %7 = arith.maximumf %5, %6 : vector<8x256xf32>
    %c0_6 = arith.constant 0 : index
    %c0_7 = arith.constant 0 : index
    %8 = vector.load %arg2[%c0_6, %c0_7] : memref<256x256xf32, #tpu.memory_space<vmem>>, vector<256x256xf32>
    %cst_8 = arith.constant dense<0.000000e+00> : vector<8x256xf32>
    %9 = tpu.matmul %7, %8, %cst_8 {dimension_numbers = #tpu.dot_dimension_numbers<[1], [0], [0], [1], [0, 0, 1, 1], [], []>} : vector<8x256xf32>, vector<256x256xf32>, vector<8x256xf32> -> vector<8x256xf32>
    %c1 = arith.constant 1 : index
    %c0_9 = arith.constant 0 : index
    %10 = vector.load %arg4[%c1, %c0_9] : memref<3x256xf32, #tpu.memory_space<vmem>>, vector<1x256xf32>
    %11 = vector.broadcast %10 : vector<1x256xf32> to vector<8x256xf32>
    %12 = arith.addf %9, %11 : vector<8x256xf32>
    %cst_10 = arith.constant 0.000000e+00 : f32
    %13 = vector.broadcast %cst_10 : f32 to vector<8x256xf32>
    %14 = arith.maximumf %12, %13 : vector<8x256xf32>
    %c0_11 = arith.constant 0 : index
    %c0_12 = arith.constant 0 : index
    %15 = vector.load %arg3[%c0_11, %c0_12] : memref<256x128xf32, #tpu.memory_space<vmem>>, vector<256x128xf32>
    %cst_13 = arith.constant dense<0.000000e+00> : vector<8x128xf32>
    %16 = tpu.matmul %14, %15, %cst_13 {dimension_numbers = #tpu.dot_dimension_numbers<[1], [0], [0], [1], [0, 0, 1, 1], [], []>} : vector<8x256xf32>, vector<256x128xf32>, vector<8x128xf32> -> vector<8x128xf32>
    %c2 = arith.constant 2 : index
    %c0_14 = arith.constant 0 : index
    %17 = vector.load %arg4[%c2, %c0_14] : memref<3x256xf32, #tpu.memory_space<vmem>>, vector<1x128xf32>
    %18 = vector.broadcast %17 : vector<1x128xf32> to vector<8x128xf32>
    %19 = arith.addf %16, %18 : vector<8x128xf32>
    %c0_15 = arith.constant 0 : index
    %c0_16 = arith.constant 0 : index
    %20 = vector.load %arg5[%c0_15, %c0_16] : memref<8x128xf32, #tpu.memory_space<vmem>>, vector<8x128xf32>
    tpu.vector_store %arg5[%c0_15, %c0_16], %19 {strides = array<i32>} : memref<8x128xf32, #tpu.memory_space<vmem>>, vector<8x128xf32>,
    return
  }
}

</mosaic_0001>

<bundles_post_ra>
// kernel: tpu_custom_call.1
= control target key start
LH: loop header
LB: loop body
LE: loop exit
PB: predicated region body
PF: predicated region fallthrough
CT: control target
= control target key end

     0   :  { %10 = vsyncpa [#allocation3], 0  ;;  %s729_s0 = inlined_call_operand.vmem [shape: f32[8,3], index: 0, kind: input, shape index: {}]   ;;  %s730_s1 = inlined_call_operand.vmem [shape: f32[3,256], index: 1, kind: input, shape index: {}]   ;;  %s731_s2 = inlined_call_operand.hbm [shape: f32[256,256], index: 2, kind: input, shape index: {}]   ;;  %s732_s3 = inlined_call_operand.hbm [shape: f32[256,128], index: 3, kind: input, shape index: {}]   ;;  %s733_s4 = inlined_call_operand.vmem [shape: f32[3,256], index: 4, kind: input, shape index: {}]   ;;  %s734_s5 = inlined_call_operand.hbm [shape: f32[8,128], index: 5, kind: output, shape index: {}]  }
   0x1   :  { %11 = vsyncpa [#allocation6], 0 }
   0x2   :  { %12 = vsyncpa [#allocation4], 0  ;;  %s638_s18 = smov [#allocation2]   ;;  %s566_s22 = scalar_lea.hbm %s731_s2, 8192 }
   0x3   :  { %s22_s19 = sshll.u32 %s638_s18, 4  ;;  %p567_p0 = scmp.ne.s32.totalorder %s731_s2, %s566_s22  ;;  %s23_s19 = int_to_ptr.vmem [resolvable:$true] %s22_s19 }
   0x4   :  { %p570_p1 = scmp.lt.u32.totalorder %s566_s22, %s731_s2 }
   0x6   :  { %p572_p2 = pnand %p570_p1, %p567_p0 }
   0x8   :  { %575 = shalt.err (!%p572_p2)
}
   0x9   :  { %s576_s27 = scalar_lea.vmem %s23_s19, 8192  ;;  %p581_p4 = scmp.lt.s32.totalorder %s23_s19, %s23_s19 }
   0xa   :  { %p577_p3 = scmp.ne.s32.totalorder %s23_s19, %s576_s27  ;;  %p582_p5 = scmp.lt.s32.totalorder %s576_s27, %s576_s27 }
   0xc   :  { %p583_p6 = por %p582_p5, %p581_p4 }
   0xe   :  { %p584_p7 = pnand %p583_p6, %p577_p3 }
  0x10   :  { %587 = shalt.err (!%p584_p7)
}
  0x11   :  { %s639_s28 = smov 256   ;;  %s640_s29 = smov 16  }
  0x12   :  { %28 = dma.hbm_to_vmem [thread:$0]  %s731_s2, 8192, %s23_s19, [#allocation3], %s639_s28, %s639_s28, %s640_s29  }
  0x13   :  { %s641_s7 = smov [#allocation5]   ;;  %s588_s11 = scalar_lea.hbm %s732_s3, 4096 }
  0x14   :  { %s34_s8 = sshll.u32 %s641_s7, 4  ;;  %p589_p8 = scmp.ne.s32.totalorder %s732_s3, %s588_s11  ;;  %s35_s8 = int_to_ptr.vmem [resolvable:$true] %s34_s8 }
  0x15   :  { %p592_p9 = scmp.lt.u32.totalorder %s588_s11, %s732_s3 }
  0x17   :  { %p594_p10 = pnand %p592_p9, %p589_p8 }
  0x19   :  { %597 = shalt.err (!%p594_p10)
}
  0x1a   :  { %s598_s16 = scalar_lea.vmem %s35_s8, 4096  ;;  %p603_p12 = scmp.lt.s32.totalorder %s35_s8, %s35_s8 }
  0x1b   :  { %p599_p11 = scmp.ne.s32.totalorder %s35_s8, %s598_s16  ;;  %p604_p13 = scmp.lt.s32.totalorder %s598_s16, %s598_s16 }
  0x1d   :  { %p605_p0 = por %p604_p13, %p603_p12 }
  0x1f   :  { %p606_p1 = pnand %p605_p0, %p599_p11 }
  0x21   :  { %609 = shalt.err (!%p606_p1)
}
  0x22   :  { %s642_s2 = smov 128   ;;  %s643_s17 = smov 8  }
  0x23   :  { %40 = dma.hbm_to_vmem [thread:$0]  %s732_s3, 4096, %s35_s8, [#allocation6], %s642_s2, %s642_s2, %s643_s17  }
  0x24   :  { %632 = dma.done.wait [#allocation3], 8192  }
  0x25   :  { %633 = vsyncadd [#allocation3], 4294959104 }
  0x26   :  { %634 = dma.done.wait [#allocation6], 4096  }
  0x27   :  { %635 = vsyncadd [#allocation6], 4294963200  ;;  %v644_v0 = vmov 0.0   ;;  %v50_v1 = vld [vmem:[%s730_s1] sm:$0x77]  ;;  %vm69_vm0 = vcmask 1042432  }
  0x28   :  { %138 = vmatprep.mubr.f32.mxu0 %v644_v0  ;;  %v49_v2 = vld [vmem:[%s729_s0] sm:$0xff]  ;;  %v148_v3 = vld [vmem:[#allocation2 + $0x8] sm:$0xff]  ;;  %v64_v4 = vcombine.high %v50_v1, %v50_v1  ;;  %v150_v5 = vld [vmem:[#allocation2 + $0x18] sm:$0xff]  ;;  %vm65_vm1 = vcmask 23552   ;;  %s645_s27 = smov [#allocation7]  }
  0x29   :  { %v147_v6 = vld [vmem:[#allocation2] sm:$0xff]  ;;  %v149_v7 = vld [vmem:[#allocation2 + $0x10] sm:$0xff]  ;;  %v461_v8 = vpack.c.bf16 %v150_v5, %v148_v3  ;;  %v152_v10 = vld [vmem:[#allocation2 + $0x28] sm:$0xff]  ;;  %s411_s28 = sshll.u32 %s645_s27, 4  ;;  %s412_s28 = int_to_ptr.vmem [resolvable:$true] %s411_s28 }
  0x2a   :  { %v463_v9 = vpack.c.bf16 %v149_v7, %v147_v6  ;;  %v154_v11 = vld [vmem:[#allocation2 + $0x38] sm:$0xff]  ;;  %v151_v12 = vld [vmem:[#allocation2 + $0x20] sm:$0xff]  ;;  %421 = vmatprep.subr.msk.mxu0 %vm69_vm0, %v64_v4  ;;  %v153_v14 = vld [vmem:[#allocation2 + $0x30] sm:$0xff]  ;;  %s610_s29 = scalar_lea.vmem %s412_s28, 128  ;;  %p615_p3 = scmp.lt.s32.totalorder %s412_s28, %s412_s28 }
  0x2b   :  { %v465_v13 = vpack.c.bf16 %v154_v11, %v152_v10  ;;  %v156_v15 = vld [vmem:[#allocation2 + $0x48] sm:$0xff]  ;;  %v158_v16 = vld [vmem:[#allocation2 + $0x58] sm:$0xff]  ;;  %422 = vmatpush1.msk.msra.mxu0 %vm69_vm0, %v50_v1  ;;  %462 = vmatprep.subr.bf16.mxu1 %v461_v8  ;;  %v467_v17 = vpack.c.bf16 %v153_v14, %v151_v12  ;;  %v155_v19 = vld [vmem:[#allocation2 + $0x40] sm:$0xff]  ;;  %p611_p2 = scmp.ne.s32.totalorder %s412_s28, %s610_s29  ;;  %p616_p4 = scmp.lt.s32.totalorder %s610_s29, %s610_s29 }
  0x2c   :  { %423 = vmatmul.mubr.msk.f32.vlgmr.msra.gmra.mrb[0].mxu0 %vm65_vm1, %v49_v2  ;;  %464 = vmatpush1.bf16.msra.mxu1 %v463_v9  ;;  %v469_v18 = vpack.c.bf16 %v158_v16, %v156_v15  ;;  %v157_v20 = vld [vmem:[#allocation2 + $0x50] sm:$0xff]  ;;  %v160_v21 = vld [vmem:[#allocation2 + $0x68] sm:$0xff]  ;;  %v162_v22 = vld [vmem:[#allocation2 + $0x78] sm:$0xff] }
  0x2d   :  { %466 = vmatprep.subr.bf16.mxu1 %v465_v13  ;;  %v471_v23 = vpack.c.bf16 %v157_v20, %v155_v19  ;;  %v473_v24 = vpack.c.bf16 %v162_v22, %v160_v21  ;;  %v159_v25 = vld [vmem:[#allocation2 + $0x60] sm:$0xff]  ;;  %v161_v26 = vld [vmem:[#allocation2 + $0x70] sm:$0xff]  ;;  %v164_v27 = vld [vmem:[#allocation2 + $0x88] sm:$0xff]  ;;  %p617_p5 = por %p616_p4, %p615_p3 }
  0x2e   :  { %v166_v28 = vld [vmem:[#allocation2 + $0x98] sm:$0xff]  ;;  %v475_v29 = vpack.c.bf16 %v161_v26, %v159_v25  ;;  %v163_v31 = vld [vmem:[#allocation2 + $0x80] sm:$0xff]  ;;  %v165_v32 = vld [vmem:[#allocation2 + $0x90] sm:$0xff] }
  0x2f   :  { %v477_v30 = vpack.c.bf16 %v166_v28, %v164_v27  ;;  %v168_v33 = vld [vmem:[#allocation2 + $0xa8] sm:$0xff]  ;;  %v170_v34 = vld [vmem:[#allocation2 + $0xb8] sm:$0xff]  ;;  %v479_v35 = vpack.c.bf16 %v165_v32, %v163_v31  ;;  %v167_v37 = vld [vmem:[#allocation2 + $0xa0] sm:$0xff]  ;;  %p618_p6 = pnand %p617_p5, %p611_p2 }
  0x30   :  { %468 = vmatpush1.bf16.msra.mxu1 %v467_v17  ;;  %v481_v36 = vpack.c.bf16 %v170_v34, %v168_v33  ;;  %v169_v38 = vld [vmem:[#allocation2 + $0xb0] sm:$0xff]  ;;  %v172_v39 = vld [vmem:[#allocation2 + $0xc8] sm:$0xff]  ;;  %v174_v40 = vld [vmem:[#allocation2 + $0xd8] sm:$0xff] }
  0x31   :  { %470 = vmatprep.subr.bf16.mxu1 %v469_v18  ;;  %v483_v41 = vpack.c.bf16 %v169_v38, %v167_v37  ;;  %v485_v42 = vpack.c.bf16 %v174_v40, %v172_v39  ;;  %v171_v43 = vld [vmem:[#allocation2 + $0xc0] sm:$0xff]  ;;  %v173_v44 = vld [vmem:[#allocation2 + $0xd0] sm:$0xff]  ;;  %v176_v45 = vld [vmem:[#allocation2 + $0xe8] sm:$0xff] }
  0x32   :  { %v178_v46 = vld [vmem:[#allocation2 + $0xf8] sm:$0xff]  ;;  %v487_v47 = vpack.c.bf16 %v173_v44, %v171_v43  ;;  %v175_v49 = vld [vmem:[#allocation2 + $0xe0] sm:$0xff]  ;;  %v177_v50 = vld [vmem:[#allocation2 + $0xf0] sm:$0xff] }
  0x33   :  { %v489_v48 = vpack.c.bf16 %v178_v46, %v176_v45  ;;  %v180_v51 = vld [vmem:[#allocation2 + $0x108] sm:$0xff]  ;;  %v182_v52 = vld [vmem:[#allocation2 + $0x118] sm:$0xff]  ;;  %v491_v53 = vpack.c.bf16 %v177_v50, %v175_v49  ;;  %v179_v55 = vld [vmem:[#allocation2 + $0x100] sm:$0xff] }
  0x34   :  { %472 = vmatpush1.bf16.msra.mxu1 %v471_v23  ;;  %v493_v54 = vpack.c.bf16 %v182_v52, %v180_v51  ;;  %v181_v56 = vld [vmem:[#allocation2 + $0x110] sm:$0xff]  ;;  %v184_v57 = vld [vmem:[#allocation2 + $0x128] sm:$0xff]  ;;  %v186_v58 = vld [vmem:[#allocation2 + $0x138] sm:$0xff] }
  0x35   :  { %474 = vmatprep.subr.bf16.mxu1 %v473_v24  ;;  %v495_v59 = vpack.c.bf16 %v181_v56, %v179_v55  ;;  %v497_v60 = vpack.c.bf16 %v186_v58, %v184_v57  ;;  %v183_v61 = vld [vmem:[#allocation2 + $0x120] sm:$0xff]  ;;  %v185_v62 = vld [vmem:[#allocation2 + $0x130] sm:$0xff]  ;;  %v188_v63 = vld [vmem:[#allocation2 + $0x148] sm:$0xff] }
  0x36   :  { %v190_v0 = vld [vmem:[#allocation2 + $0x158] sm:$0xff]  ;;  %v499_v1 = vpack.c.bf16 %v185_v62, %v183_v61  ;;  %v187_v3 = vld [vmem:[#allocation2 + $0x140] sm:$0xff]  ;;  %v189_v4 = vld [vmem:[#allocation2 + $0x150] sm:$0xff] }
  0x37   :  { %v501_v2 = vpack.c.bf16 %v190_v0, %v188_v63  ;;  %v192_v5 = vld [vmem:[#allocation2 + $0x168] sm:$0xff]  ;;  %v194_v6 = vld [vmem:[#allocation2 + $0x178] sm:$0xff]  ;;  %v503_v7 = vpack.c.bf16 %v189_v4, %v187_v3  ;;  %v191_v9 = vld [vmem:[#allocation2 + $0x160] sm:$0xff] }
  0x38   :  { %476 = vmatpush1.bf16.msra.mxu1 %v475_v29  ;;  %v505_v8 = vpack.c.bf16 %v194_v6, %v192_v5  ;;  %v193_v10 = vld [vmem:[#allocation2 + $0x170] sm:$0xff]  ;;  %v196_v11 = vld [vmem:[#allocation2 + $0x188] sm:$0xff]  ;;  %v198_v12 = vld [vmem:[#allocation2 + $0x198] sm:$0xff] }
  0x39   :  { %478 = vmatprep.subr.bf16.mxu1 %v477_v30  ;;  %v507_v13 = vpack.c.bf16 %v193_v10, %v191_v9  ;;  %v509_v14 = vpack.c.bf16 %v198_v12, %v196_v11  ;;  %v195_v15 = vld [vmem:[#allocation2 + $0x180] sm:$0xff]  ;;  %v197_v16 = vld [vmem:[#allocation2 + $0x190] sm:$0xff]  ;;  %v200_v17 = vld [vmem:[#allocation2 + $0x1a8] sm:$0xff]  ;;  %v53_v11 = vlaneseq }
  0x3a   :  { %v202_v18 = vld [vmem:[#allocation2 + $0x1b8] sm:$0xff]  ;;  %v511_v19 = vpack.c.bf16 %v197_v16, %v195_v15  ;;  %v199_v21 = vld [vmem:[#allocation2 + $0x1a0] sm:$0xff]  ;;  %v201_v22 = vld [vmem:[#allocation2 + $0x1b0] sm:$0xff] }
  0x3b   :  { %v513_v20 = vpack.c.bf16 %v202_v18, %v200_v17  ;;  %v204_v23 = vld [vmem:[#allocation2 + $0x1c8] sm:$0xff]  ;;  %v206_v24 = vld [vmem:[#allocation2 + $0x1d8] sm:$0xff]  ;;  %v515_v25 = vpack.c.bf16 %v201_v22, %v199_v21  ;;  %v203_v27 = vld [vmem:[#allocation2 + $0x1c0] sm:$0xff]  ;;  %v54_v12 = vshrl.u32 %v53_v11, 7 }
  0x3c   :  { %480 = vmatpush1.bf16.msra.mxu1 %v479_v35  ;;  %v517_v26 = vpack.c.bf16 %v206_v24, %v204_v23  ;;  %v205_v28 = vld [vmem:[#allocation2 + $0x1d0] sm:$0xff]  ;;  %v208_v30 = vld [vmem:[#allocation2 + $0x1e8] sm:$0xff]  ;;  %v210_v31 = vld [vmem:[#allocation2 + $0x1f8] sm:$0xff] }
  0x3d   :  { %482 = vmatprep.subr.bf16.mxu1 %v481_v36  ;;  %v519_v29 = vpack.c.bf16 %v205_v28, %v203_v27  ;;  %v521_v32 = vpack.c.bf16 %v210_v31, %v208_v30  ;;  %v207_v33 = vld [vmem:[#allocation2 + $0x1e0] sm:$0xff]  ;;  %v209_v34 = vld [vmem:[#allocation2 + $0x1f0] sm:$0xff]  ;;  %v314_v37 = vld [vmem:[#allocation5 + $0x88] sm:$0xff]  ;;  %v59_v15 = vsub.s32 1, %v54_v12 }
  0x3e   :  { %v523_v35 = vpack.c.bf16 %v209_v34, %v207_v33  ;;  %v313_v36 = vld [vmem:[#allocation5 + $0x80] sm:$0xff]  ;;  %v298_v40 = vld [vmem:[#allocation5 + $0x8] sm:$0xff]  ;;  %v299_v45 = vld [vmem:[#allocation5 + $0x10] sm:$0xff] }
  0x3f   :  { %v297_v38 = vld [vmem:[#allocation5] sm:$0xff]  ;;  %v525_v39 = vpack.c.bf16 %v314_v37, %v313_v36  ;;  %v300_v46 = vld [vmem:[#allocation5 + $0x18] sm:$0xff]  ;;  %v302_v52 = vld [vmem:[#allocation5 + $0x28] sm:$0xff] }
  0x40   :  { %484 = vmatpush1.bf16.msra.mxu1 %v483_v41  ;;  %v315_v41 = vld [vmem:[#allocation5 + $0x90] sm:$0xff]  ;;  %v527_v43 = vpack.c.bf16 %v298_v40, %v297_v38  ;;  %v531_v49 = vpack.c.bf16 %v300_v46, %v299_v45  ;;  %v301_v51 = vld [vmem:[#allocation5 + $0x20] sm:$0xff]  ;;  %v304_v58 = vld [vmem:[#allocation5 + $0x38] sm:$0xff] }
  0x41   :  { %486 = vmatprep.subr.bf16.mxu1 %v485_v42  ;;  %v316_v42 = vld [vmem:[#allocation5 + $0x98] sm:$0xff]  ;;  %526 = vmatprep.subr.bf16.mxu0 %v525_v39  ;;  %v535_v55 = vpack.c.bf16 %v302_v52, %v301_v51  ;;  %v303_v57 = vld [vmem:[#allocation5 + $0x30] sm:$0xff]  ;;  %v305_v63 = vld [vmem:[#allocation5 + $0x40] sm:$0xff] }
  0x42   :  { %v529_v44 = vpack.c.bf16 %v316_v42, %v315_v41  ;;  %528 = vmatpush3.bf16.msra.mxu0 %v527_v43  ;;  %v539_v61 = vpack.c.bf16 %v304_v58, %v303_v57  ;;  %v306_v0 = vld [vmem:[#allocation5 + $0x48] sm:$0xff]  ;;  %v307_v5 = vld [vmem:[#allocation5 + $0x50] sm:$0xff]  ;;  %v308_v6 = vld [vmem:[#allocation5 + $0x58] sm:$0xff] }
  0x43   :  { %v543_v3 = vpack.c.bf16 %v306_v0, %v305_v63  ;;  %v547_v9 = vpack.c.bf16 %v308_v6, %v307_v5  ;;  %v309_v24 = vld [vmem:[#allocation5 + $0x60] sm:$0xff]  ;;  %v327_v27 = vld [vmem:[#allocation5 + $0xf0] sm:$0xff]  ;;  %v328_v28 = vld [vmem:[#allocation5 + $0xf8] sm:$0xff] }
  0x44   :  { %488 = vmatpush1.bf16.msra.mxu1 %v487_v47  ;;  %v317_v47 = vld [vmem:[#allocation5 + $0xa0] sm:$0xff]  ;;  %530 = vmatprep.subr.bf16.mxu0 %v529_v44  ;;  %v311_v30 = vld [vmem:[#allocation5 + $0x70] sm:$0xff]  ;;  %v312_v31 = vld [vmem:[#allocation5 + $0x78] sm:$0xff] }
  0x45   :  { %490 = vmatprep.subr.bf16.mxu1 %v489_v48  ;;  %v318_v48 = vld [vmem:[#allocation5 + $0xa8] sm:$0xff]  ;;  %v424_v33 = vld [vmem:[%s733_s4 + $0x1] ss:$4 sm:$0x3]  ;;  %v425_v43 = vld [vmem:[%s733_s4 + $0x2] ss:$0 sm:$0xff] }
  0x46   :  { %v533_v50 = vpack.c.bf16 %v318_v48, %v317_v47  ;;  %532 = vmatpush3.bf16.msra.mxu0 %v531_v49 }
  0x48   :  { %492 = vmatpush1.bf16.msra.mxu1 %v491_v53  ;;  %v319_v53 = vld [vmem:[#allocation5 + $0xb0] sm:$0xff]  ;;  %534 = vmatprep.subr.bf16.mxu0 %v533_v50 }
  0x49   :  { %494 = vmatprep.subr.bf16.mxu1 %v493_v54  ;;  %v320_v54 = vld [vmem:[#allocation5 + $0xb8] sm:$0xff] }
  0x4a   :  { %v537_v56 = vpack.c.bf16 %v320_v54, %v319_v53  ;;  %536 = vmatpush3.bf16.msra.mxu0 %v535_v55 }
  0x4c   :  { %496 = vmatpush1.bf16.msra.mxu1 %v495_v59  ;;  %v321_v59 = vld [vmem:[#allocation5 + $0xc0] sm:$0xff]  ;;  %538 = vmatprep.subr.bf16.mxu0 %v537_v56 }
  0x4d   :  { %498 = vmatprep.subr.bf16.mxu1 %v497_v60  ;;  %v322_v60 = vld [vmem:[#allocation5 + $0xc8] sm:$0xff] }
  0x4e   :  { %v541_v62 = vpack.c.bf16 %v322_v60, %v321_v59  ;;  %540 = vmatpush3.bf16.msra.mxu0 %v539_v61 }
  0x50   :  { %500 = vmatpush1.bf16.msra.mxu1 %v499_v1  ;;  %v323_v1 = vld [vmem:[#allocation5 + $0xd0] sm:$0xff]  ;;  %542 = vmatprep.subr.bf16.mxu0 %v541_v62 }
  0x51   :  { %502 = vmatprep.subr.bf16.mxu1 %v501_v2  ;;  %v324_v2 = vld [vmem:[#allocation5 + $0xd8] sm:$0xff] }
  0x52   :  { %v545_v4 = vpack.c.bf16 %v324_v2, %v323_v1  ;;  %544 = vmatpush3.bf16.msra.mxu0 %v543_v3 }
  0x54   :  { %504 = vmatpush1.bf16.msra.mxu1 %v503_v7  ;;  %v325_v7 = vld [vmem:[#allocation5 + $0xe0] sm:$0xff]  ;;  %546 = vmatprep.subr.bf16.mxu0 %v545_v4 }
  0x55   :  { %506 = vmatprep.subr.bf16.mxu1 %v505_v8  ;;  %v326_v8 = vld [vmem:[#allocation5 + $0xe8] sm:$0xff] }
  0x56   :  { %v549_v10 = vpack.c.bf16 %v326_v8, %v325_v7  ;;  %548 = vmatpush3.bf16.msra.mxu0 %v547_v9 }
  0x58   :  { %508 = vmatpush1.bf16.msra.mxu1 %v507_v13  ;;  %550 = vmatprep.subr.bf16.mxu0 %v549_v10  ;;  %v55_v13 = vsub.s32 0, %v54_v12 }
  0x59   :  { %510 = vmatprep.subr.bf16.mxu1 %v509_v14  ;;  %v51_v14 = vld [vmem:[%s733_s4] ss:$4 sm:$0x3] }
  0x5a   :  { %v56_v16 = vrot.slane %v51_v14, %v55_v13  ;;  %v60_v17 = vrot.slane %v51_v14, %v59_v15  ;;  %v217_v34 = vrot.slane %v424_v33, %v55_v13 }
  0x5c   :  { %512 = vmatpush1.bf16.msra.mxu1 %v511_v19 }
  0x5d   :  { %514 = vmatprep.subr.bf16.mxu1 %v513_v20 }
  0x60   :  { %516 = vmatpush1.bf16.msra.mxu1 %v515_v25  ;;  %v310_v25 = vld [vmem:[#allocation5 + $0x68] sm:$0xff] }
  0x61   :  { %518 = vmatprep.subr.bf16.mxu1 %v517_v26  ;;  %v551_v26 = vpack.c.bf16 %v310_v25, %v309_v24 }
  0x63   :  { %552 = vmatpush3.bf16.msra.mxu0 %v551_v26 }
  0x64   :  { %520 = vmatpush1.bf16.msra.mxu1 %v519_v29  ;;  %v553_v29 = vpack.c.bf16 %v328_v28, %v327_v27 }
  0x65   :  { %522 = vmatprep.subr.bf16.mxu1 %v521_v32  ;;  %v555_v32 = vpack.c.bf16 %v312_v31, %v311_v30 }
  0x66   :  { %554 = vmatprep.subr.bf16.mxu0 %v553_v29 }
  0x67   :  { %556 = vmatpush3.bf16.msra.mxu0 %v555_v32 }
  0x68   :  { %524 = vmatpush1.bf16.msra.mxu1 %v523_v35  ;;  %v221_v35 = vrot.slane %v424_v33, %v59_v15 }
  0xff   :  { %v140_v18 = vpop.f32.mrb[0].mxu0 }
 0x100   :  { %v141_v19 = vadd.f32 %v140_v18, %v56_v16  ;;  %v142_v20 = vpop.f32.mrb[1].mxu0 }
 0x101   :  { %v143_v21 = vadd.f32 %v142_v20, %v60_v17 }
 0x102   :  { %v145_v23 = vmax.f32 %v141_v19, 0.0 }
 0x103   :  { %v146_v22 = vmax.f32 %v143_v21, 0.0 }
 0x105   :  { %288 = vmatprep.mubr.f32.mxu1 %v146_v22 }
 0x106   :  { %289 = vmatmul.mubr.f32.vlgmr.msra.gmra.mrb[0].mxu1 %v145_v23 }
 0x1d9   :  { %v290_v36 = vpop.f32.mrb[0].mxu1 }
 0x1da   :  { %v291_v37 = vadd.f32 %v290_v36, %v217_v34  ;;  %v292_v38 = vpop.f32.mrb[1].mxu1 }
 0x1db   :  { %v293_v39 = vadd.f32 %v292_v38, %v221_v35 }
 0x1dc   :  { %v295_v41 = vmax.f32 %v291_v37, 0.0 }
 0x1dd   :  { %v296_v40 = vmax.f32 %v293_v39, 0.0 }
 0x1df   :  { %398 = vmatprep.mubr.f32.mxu0 %v296_v40 }
 0x1e0   :  { %399 = vmatmul.mubr.f32.vlgmr.msra.gmra.mrb[2].mxu0 %v295_v41 }
 0x2b3   :  { %v458_v42 = vpop.f32.mrb[2].mxu0 }
 0x2b4   :  { %v459_v44 = vpop.f32.mrb[3].mxu0 }
 0x2b5   :  { %v460_v45 = vadd.f32 %v459_v44, %v458_v42 }
 0x2b7   :  { %v401_v46 = vadd.f32 %v460_v45, %v425_v43 }
 0x2b9   :  { %404 = vst [vmem:[#allocation7] sm:$0xff] %v401_v46 }
 0x2ba   :  { %621 = shalt.err (!%p618_p6)
}
 0x2bb   :  { %s622_s7 = scalar_lea.hbm %s734_s5, 128 }
 0x2bc   :  { %p623_p7 = scmp.ne.s32.totalorder %s734_s5, %s622_s7  ;;  %p626_p8 = scmp.lt.u32.totalorder %s622_s7, %s734_s5 }
 0x2be   :  { %p628_p9 = pnand %p626_p8, %p623_p7 }
 0x2c0   :  { %631 = shalt.err (!%p628_p9)
}
 0x2c1   :  { %414 = dma.vmem_to_hbm [thread:$0]  %s412_s28, 128, %s734_s5, [#allocation4]  }
 0x2c2   :  { %636 = dma.done.wait [#allocation4], 128  }
 0x2c3   :  { %637 = vsyncadd [#allocation4], 4294967168 }
 0x2c4   :  { %418 = vsyncpa [#allocation3], 1 }
 0x2c5   :  { %419 = vsyncpa [#allocation6], 1 }
 0x2c6   :  { %420 = vsyncpa [#allocation4], 1 }

</bundles_post_ra>
